<compile_context>
chip_gen: v7x
topology: tpu7x:2x2x1
jax: 0.10.0
libtpu: 0.0.40
codegen_flags: <defaults>
</compile_context>

<pallas_src>
import functools
import math

import jax
import jax.numpy as jnp
import numpy as np
from jax import lax
from jax.experimental import pallas as pl
from jax.experimental.pallas import tpu as pltpu


# ------------------------------ tiling helper --------------------------------

def _pick_tile(dim, target):
    """Use `target` if it evenly divides `dim`, otherwise fall back to the full
    dim (keeps the (8,128) block rule satisfied at any size)."""
    if dim <= target:
        return dim
    if dim % target == 0:
        return target
    return dim


# --------------------------- tiled matmul kernel ------------------------------

def _matmul_kernel(x_ref, w_ref, o_ref, acc_ref):
    # x tile: (tm, tk); w tile: (tn, tk) [PyTorch nn.Linear layout]; o: (tm, tn)
    @pl.when(pl.program_id(2) == 0)
    def _():
        acc_ref[...] = jnp.zeros(acc_ref.shape, acc_ref.dtype)

    # contract the K dim of both operands directly -- no in-kernel transpose.
    acc_ref[...] += lax.dot_general(
        x_ref[...], w_ref[...],
        dimension_numbers=(((1,), (1,)), ((), ())),
        preferred_element_type=jnp.float32)

    @pl.when(pl.program_id(2) == pl.num_programs(2) - 1)
    def _():
        o_ref[...] = acc_ref[...].astype(o_ref.dtype)


def matmul(x, w, *, tm=256, tn=256, tk=512):
    """x: (M, K), w: (N, K) [torch nn.Linear weight layout] -> x @ w.T : (M, N)."""
    M, K = x.shape
    N = w.shape[0]
    tm, tn, tk = _pick_tile(M, tm), _pick_tile(N, tn), _pick_tile(K, tk)
    grid = (M // tm, N // tn, K // tk)
    return pl.pallas_call(
        _matmul_kernel,
        out_shape=jax.ShapeDtypeStruct((M, N), x.dtype),
        grid_spec=pltpu.PrefetchScalarGridSpec(
            num_scalar_prefetch=0,
            grid=grid,
            in_specs=[
                pl.BlockSpec((tm, tk), lambda i, j, k: (i, k)),
                pl.BlockSpec((tn, tk), lambda i, j, k: (j, k)),
            ],
            out_specs=pl.BlockSpec((tm, tn), lambda i, j, k: (i, j)),
            scratch_shapes=[pltpu.VMEM((tm, tn), jnp.float32)],
        ),
        compiler_params=pltpu.CompilerParams(
            dimension_semantics=("parallel", "parallel", "arbitrary")),
    )(x, w)


# ------------------------- flash attention kernel -----------------------------

def _flash_attn_kernel(q_ref, k_ref, v_ref, o_ref, m_ref, l_ref, acc_ref,
                       *, scale, start_pos, block_k, seqlen, n_rep):
    kv = pl.program_id(2)

    @pl.when(kv == 0)
    def _():
        m_ref[...] = jnp.full(m_ref.shape, -jnp.inf, m_ref.dtype)
        l_ref[...] = jnp.zeros(l_ref.shape, l_ref.dtype)
        acc_ref[...] = jnp.zeros(acc_ref.shape, acc_ref.dtype)

    # q carries all n_rep heads of the GQA group folded into its M dim:
    # row index = r * seqlen + s  (head r of the group, query position s).
    q = q_ref[...] * scale               # (n_rep*S, Dh) -- scale the small side
    k = k_ref[...]                       # (block_k, Dh) -- shared by the group
    v = v_ref[...]                       # (block_k, Dh)
    m_rows = q.shape[0]
    t_len = k.shape[0]

    # one tall MXU matmul per K/V block for the whole GQA group
    s = lax.dot_general(q, k, (((1,), (1,)), ((), ())),
                        preferred_element_type=jnp.float32)   # (n_rep*S, bk)

    # causal mask generated in-kernel (also hides cache slots >= start_pos + S).
    qpos_s = start_pos + lax.broadcasted_iota(jnp.int32, (seqlen, t_len), 0)
    qpos = jnp.tile(qpos_s, (n_rep, 1))                       # row r*S+s -> pos s
    kpos = kv * block_k + lax.broadcasted_iota(jnp.int32, (m_rows, t_len), 1)
    s = jnp.where(kpos > qpos, -1e30, s)

    m_prev = m_ref[...]                                       # (n_rep*S, 1)
    m_new = jnp.maximum(m_prev, s.max(axis=-1, keepdims=True))
    alpha = jnp.exp(m_prev - m_new)
    p = jnp.exp(s - m_new)                                    # (n_rep*S, bk)
    l_ref[...] = alpha * l_ref[...] + p.sum(axis=-1, keepdims=True)
    acc_ref[...] = alpha * acc_ref[...] + lax.dot_general(
        p.astype(v.dtype), v, (((1,), (0,)), ((), ())),
        preferred_element_type=jnp.float32)
    m_ref[...] = m_new

    @pl.when(kv == pl.num_programs(2) - 1)
    def _():
        o_ref[...] = (acc_ref[...] *
                      pl.reciprocal(l_ref[...], approx=False)).astype(o_ref.dtype)


def flash_attention(q, cache_k, cache_v, start_pos, n_rep, *, block_k=512):
    """q: (B, Hkv, n_rep*S, Dh) -- GQA group folded into the row dim;
    cache_k/v: head-major (MAX_B, Hkv, MAX_S, Dh). Reads keys/values for
    positions [0, start_pos + S) straight out of the caches.
    Returns (B, Hkv, n_rep*S, Dh)."""
    B, Hkv, M, Dh = q.shape
    S = M // n_rep
    _, _, max_s, _ = cache_k.shape
    T = start_pos + S
    bk = _pick_tile(max_s, block_k)
    num_kv = pl.cdiv(T, bk)
    scale = 1.0 / math.sqrt(Dh)

    kernel = functools.partial(_flash_attn_kernel, scale=scale,
                               start_pos=start_pos, block_k=bk,
                               seqlen=S, n_rep=n_rep)
    return pl.pallas_call(
        kernel,
        out_shape=jax.ShapeDtypeStruct((B, Hkv, M, Dh), q.dtype),
        grid_spec=pltpu.PrefetchScalarGridSpec(
            num_scalar_prefetch=0,
            grid=(B, Hkv, num_kv),
            in_specs=[
                # all n_rep query heads of KV group g per grid point (folded in M)
                pl.BlockSpec((None, None, M, Dh), lambda b, g, kv: (b, g, 0, 0)),
                # K/V tile shared across the whole group (GQA folded into index_map)
                pl.BlockSpec((None, None, bk, Dh), lambda b, g, kv: (b, g, kv, 0)),
                pl.BlockSpec((None, None, bk, Dh), lambda b, g, kv: (b, g, kv, 0)),
            ],
            out_specs=pl.BlockSpec((None, None, M, Dh),
                                   lambda b, g, kv: (b, g, 0, 0)),
            scratch_shapes=[
                pltpu.VMEM((M, 1), jnp.float32),    # running max
                pltpu.VMEM((M, 1), jnp.float32),    # running denominator
                pltpu.VMEM((M, Dh), jnp.float32),   # running numerator
            ],
        ),
        compiler_params=pltpu.CompilerParams(
            dimension_semantics=("parallel", "parallel", "arbitrary")),
    )(q, cache_k, cache_v)


# ------------------- in-place KV cache write-back (aliased) -------------------

def _cache_update_kernel(new_ref, cache_in_ref, cache_out_ref,
                         *, batch, start_pos, seqlen):
    del cache_in_ref  # aliased with cache_out_ref; only the new slice is written
    dst = cache_out_ref.at[pl.ds(0, batch),
                           pl.ds(0, cache_out_ref.shape[1]),
                           pl.ds(start_pos, seqlen)]
    pltpu.sync_copy(new_ref, dst)


def cache_update(cache, new, start_pos):
    """Write `new` (B, Hkv, S, Dh) into `cache` (MAX_B, Hkv, MAX_S, Dh) at
    [:B, :, start_pos:start_pos+S]. The cache is aliased input->output, so only
    the fresh slice is DMA'd -- no full-cache copy."""
    B, Hkv, S, Dh = new.shape
    kernel = functools.partial(_cache_update_kernel, batch=B,
                               start_pos=start_pos, seqlen=S)
    return pl.pallas_call(
        kernel,
        out_shape=jax.ShapeDtypeStruct(cache.shape, cache.dtype),
        grid=(1,),
        in_specs=[
            pl.BlockSpec((B, Hkv, S, Dh), lambda i: (0, 0, 0, 0)),  # new -> VMEM
            pl.BlockSpec(memory_space=pl.ANY),                      # cache in HBM
        ],
        out_specs=pl.BlockSpec(memory_space=pl.ANY),
        input_output_aliases={1: 0},
    )(new, cache)


# --------------------------------- JAX glue -----------------------------------

def apply_rotary_emb_jax(xq, xk, cos, sin):
    """xq: (B, S, H, Dh), xk: (B, S, Hkv, Dh), cos/sin: (S, Dh//2).
    Matches torch.view_as_complex pairing: consecutive (even, odd) lanes form
    (real, imag); multiply by freqs_cis = cos + i*sin."""
    def rot(x):
        xr = x.reshape(*x.shape[:-1], -1, 2)
        a, b = xr[..., 0], xr[..., 1]
        c = cos[None, :, None, :]
        s = sin[None, :, None, :]
        return jnp.stack([a * c - b * s, a * s + b * c], axis=-1).reshape(x.shape)

    return rot(xq), rot(xk)


def attention_forward(x, start_pos, wq, wk, wv, wo, n_heads, n_kv_heads,
                      cache_k, cache_v, rope_theta=500000.0):
    """x: (B, S, D); cache_k/v: head-major (MAX_B, Hkv, MAX_S, Dh).
    Returns (output (B, S, D), updated cache_k, updated cache_v)."""
    B, S, D = x.shape
    head_dim = D // n_heads
    n_rep = n_heads // n_kv_heads
    nq = n_heads * head_dim
    nkv = n_kv_heads * head_dim

    # --- fused QKV projection: one tiled Pallas matmul over [wq; wk; wv] ---
    x2d = x.reshape(B * S, D)
    wqkv = jnp.concatenate([wq, wk, wv], axis=0)          # (nq + 2*nkv, D)
    qkv = matmul(x2d, wqkv)                               # (B*S, nq + 2*nkv)
    xq = qkv[:, :nq].reshape(B, S, n_heads, head_dim)
    xk = qkv[:, nq:nq + nkv].reshape(B, S, n_kv_heads, head_dim)
    xv = qkv[:, nq + nkv:].reshape(B, S, n_kv_heads, head_dim)

    # --- RoPE on the new tokens (JAX glue) ---
    # TODO(synk): fuse the interleaved-pair rotation into the QKV kernel epilogue.
    freqs = 1.0 / (rope_theta ** (jnp.arange(0, head_dim, 2, dtype=jnp.float32)
                                  / head_dim))
    t = jnp.arange(start_pos, start_pos + S, dtype=jnp.float32)
    ang = jnp.outer(t, freqs)                             # (S, head_dim // 2)
    xq, xk = apply_rotary_emb_jax(xq, xk, jnp.cos(ang), jnp.sin(ang))

    # --- in-place KV cache update (aliased DMA, no full-cache copy) ---
    cache_k = cache_update(cache_k, jnp.transpose(xk, (0, 2, 1, 3)), start_pos)
    cache_v = cache_update(cache_v, jnp.transpose(xv, (0, 2, 1, 3)), start_pos)

    # --- flash attention straight out of the caches (no repeat_kv, no slice) ---
    # Fold each GQA group's n_rep heads into the row dim: (B, Hkv, n_rep*S, Dh).
    q = jnp.transpose(xq, (0, 2, 1, 3))                   # (B, H, S, Dh)
    q = q.reshape(B, n_kv_heads, n_rep * S, head_dim)
    out = flash_attention(q, cache_k, cache_v, start_pos, n_rep)
    out = out.reshape(B, n_heads, S, head_dim)            # unfold the group

    # --- output projection ---
    out2d = jnp.transpose(out, (0, 2, 1, 3)).reshape(B * S, nq)
    return matmul(out2d, wo).reshape(B, S, D), cache_k, cache_v


# ---------------------------- pure-JAX reference ------------------------------

def attention_reference(x, start_pos, wq, wk, wv, wo, n_heads, n_kv_heads,
                        cache_k, cache_v, rope_theta=500000.0):
    """Reference with the PyTorch cache layout (MAX_B, MAX_S, Hkv, Dh)."""
    B, S, D = x.shape
    head_dim = D // n_heads
    n_rep = n_heads // n_kv_heads

    xq = (x @ wq.T).reshape(B, S, n_heads, head_dim)
    xk = (x @ wk.T).reshape(B, S, n_kv_heads, head_dim)
    xv = (x @ wv.T).reshape(B, S, n_kv_heads, head_dim)

    freqs = 1.0 / (rope_theta ** (jnp.arange(0, head_dim, 2, dtype=jnp.float32)
                                  / head_dim))
    t = jnp.arange(start_pos, start_pos + S, dtype=jnp.float32)
    ang = jnp.outer(t, freqs)
    xq, xk = apply_rotary_emb_jax(xq, xk, jnp.cos(ang), jnp.sin(ang))

    cache_k = cache_k.at[:B, start_pos:start_pos + S].set(xk)
    cache_v = cache_v.at[:B, start_pos:start_pos + S].set(xv)
    keys = jnp.repeat(cache_k[:B, :start_pos + S], n_rep, axis=2)
    values = jnp.repeat(cache_v[:B, :start_pos + S], n_rep, axis=2)

    q = jnp.transpose(xq, (0, 2, 1, 3))
    k = jnp.transpose(keys, (0, 2, 1, 3))
    v = jnp.transpose(values, (0, 2, 1, 3))

    T = start_pos + S
    mask = jnp.where(jnp.arange(T)[None, :] > (jnp.arange(S)[:, None] + start_pos),
                     -jnp.inf, 0.0).astype(jnp.float32)

    scores = jnp.einsum("bhsd,bhtd->bhst", q, k) / math.sqrt(head_dim) + mask
    scores = jax.nn.softmax(scores.astype(jnp.float32), axis=-1)
    out = jnp.einsum("bhst,bhtd->bhsd", scores, v)
    out = jnp.transpose(out, (0, 2, 1, 3)).reshape(B, S, -1)
    return out @ wo.T, cache_k, cache_v


# ----------------------------------- main --------------------------------------

if __name__ == "__main__":
    # ModelArgs: dim=32, n_heads=4, n_kv_heads=2 -> head_dim=8, n_rep=2
    B, S1, S2, DIM, NH, NKV = 2, 8, 4, 32, 4, 2
    HD = DIM // NH
    MAX_B, MAX_S = 4, 32

    key = jax.random.PRNGKey(0)
    k1, k2, k3, k4, k5, k6 = jax.random.split(key, 6)
    init = 1.0 / math.sqrt(DIM)
    wq = jax.random.normal(k1, (NH * HD, DIM), jnp.float32) * init
    wk = jax.random.normal(k2, (NKV * HD, DIM), jnp.float32) * init
    wv = jax.random.normal(k3, (NKV * HD, DIM), jnp.float32) * init
    wo = jax.random.normal(k4, (DIM, NH * HD), jnp.float32) * init
    x1 = jax.random.normal(k5, (B, S1, DIM), jnp.float32)   # "prefill" chunk
    x2 = jax.random.normal(k6, (B, S2, DIM), jnp.float32)   # "decode" chunk

    # Pallas path: head-major KV caches (MAX_B, Hkv, MAX_S, Dh)
    ck = jnp.zeros((MAX_B, NKV, MAX_S, HD), jnp.float32)
    cv = jnp.zeros((MAX_B, NKV, MAX_S, HD), jnp.float32)
    out1, ck, cv = attention_forward(x1, 0, wq, wk, wv, wo, NH, NKV, ck, cv)
    out2, ck, cv = attention_forward(x2, S1, wq, wk, wv, wo, NH, NKV, ck, cv)
    out2 = jax.block_until_ready(out2)

    # Reference path: PyTorch cache layout (MAX_B, MAX_S, Hkv, Dh)
    rck = jnp.zeros((MAX_B, MAX_S, NKV, HD), jnp.float32)
    rcv = jnp.zeros((MAX_B, MAX_S, NKV, HD), jnp.float32)
    ref1, rck, rcv = attention_reference(x1, 0, wq, wk, wv, wo, NH, NKV, rck, rcv)
    ref2, rck, rcv = attention_reference(x2, S1, wq, wk, wv, wo, NH, NKV, rck, rcv)

    np.testing.assert_allclose(np.asarray(out1), np.asarray(ref1),
                               rtol=1e-4, atol=1e-4)
    np.testing.assert_allclose(np.asarray(out2), np.asarray(ref2),
                               rtol=1e-4, atol=1e-4)
    print("KERNEL_OK")
</pallas_src>

<mosaic_0001>
module attributes {stable_mosaic.version = 11 : i64} {
  func.func @_matmul_kernel(%arg0: i32, %arg1: i32, %arg2: i32, %arg3: memref<16x32xf32, #tpu.memory_space<vmem>>, %arg4: memref<64x32xf32, #tpu.memory_space<vmem>>, %arg5: memref<16x64xf32, #tpu.memory_space<vmem>>, %arg6: memref<16x64xf32, #tpu.memory_space<vmem>>) attributes {dimension_semantics = [#tpu.dimension_semantics<parallel>, #tpu.dimension_semantics<parallel>, #tpu.dimension_semantics<arbitrary>], iteration_bounds = array<i64: 1, 1, 1>, scalar_prefetch = 0 : i64, scratch_operands = 1 : i64, tpu.core_type = #tpu.core_type<tc>, window_params = [{transform_indices = @transform_0, window_bounds = array<i64: 16, 32>}, {transform_indices = @transform_1, window_bounds = array<i64: 64, 32>}, {transform_indices = @transform_2, window_bounds = array<i64: 16, 64>}]} {
    %c0_i32 = arith.constant 0 : i32
    %0 = arith.cmpi eq, %arg2, %c0_i32 : i32
    %1 = arith.extui %0 : i1 to i32
    %c0_i32_0 = arith.constant 0 : i32
    %2 = arith.cmpi ne, %1, %c0_i32_0 : i32
    scf.if %2 {
      %cst_10 = arith.constant 0.000000e+00 : f32
      %12 = vector.broadcast %cst_10 : f32 to vector<16x64xf32>
      %c0_11 = arith.constant 0 : index
      %c0_12 = arith.constant 0 : index
      %13 = vector.load %arg6[%c0_11, %c0_12] : memref<16x64xf32, #tpu.memory_space<vmem>>, vector<16x64xf32>
      tpu.vector_store %arg6[%c0_11, %c0_12], %12 {strides = array<i32>} : memref<16x64xf32, #tpu.memory_space<vmem>>, vector<16x64xf32>,
    } else {
    }
    %c0 = arith.constant 0 : index
    %c0_1 = arith.constant 0 : index
    %3 = vector.load %arg6[%c0, %c0_1] : memref<16x64xf32, #tpu.memory_space<vmem>>, vector<16x64xf32>
    %c0_2 = arith.constant 0 : index
    %c0_3 = arith.constant 0 : index
    %4 = vector.load %arg3[%c0_2, %c0_3] : memref<16x32xf32, #tpu.memory_space<vmem>>, vector<16x32xf32>
    %c0_4 = arith.constant 0 : index
    %c0_5 = arith.constant 0 : index
    %5 = vector.load %arg4[%c0_4, %c0_5] : memref<64x32xf32, #tpu.memory_space<vmem>>, vector<64x32xf32>
    %cst = arith.constant dense<0.000000e+00> : vector<16x64xf32>
    %6 = tpu.matmul %4, %5, %cst {dimension_numbers = #tpu.dot_dimension_numbers<[1], [1], [0], [0], [0, 0, 1, 0], [], []>} : vector<16x32xf32>, vector<64x32xf32>, vector<16x64xf32> -> vector<16x64xf32>
    %7 = arith.addf %3, %6 : vector<16x64xf32>
    %c0_6 = arith.constant 0 : index
    %c0_7 = arith.constant 0 : index
    %8 = vector.load %arg6[%c0_6, %c0_7] : memref<16x64xf32, #tpu.memory_space<vmem>>, vector<16x64xf32>
    tpu.vector_store %arg6[%c0_6, %c0_7], %7 {strides = array<i32>} : memref<16x64xf32, #tpu.memory_space<vmem>>, vector<16x64xf32>,
    %c0_i32_8 = arith.constant 0 : i32
    %9 = arith.cmpi eq, %arg2, %c0_i32_8 : i32
    %10 = arith.extui %9 : i1 to i32
    %c0_i32_9 = arith.constant 0 : i32
    %11 = arith.cmpi ne, %10, %c0_i32_9 : i32
    scf.if %11 {
      %c0_10 = arith.constant 0 : index
      %c0_11 = arith.constant 0 : index
      %12 = vector.load %arg6[%c0_10, %c0_11] : memref<16x64xf32, #tpu.memory_space<vmem>>, vector<16x64xf32>
      %c0_12 = arith.constant 0 : index
      %c0_13 = arith.constant 0 : index
      %13 = vector.load %arg5[%c0_12, %c0_13] : memref<16x64xf32, #tpu.memory_space<vmem>>, vector<16x64xf32>
      tpu.vector_store %arg5[%c0_12, %c0_13], %12 {strides = array<i32>} : memref<16x64xf32, #tpu.memory_space<vmem>>, vector<16x64xf32>,
    } else {
    }
    return
  }
  func.func @transform_0(%arg0: i32, %arg1: i32, %arg2: i32) -> (i32, i32) {
    %c0_i32 = arith.constant 0 : i32
    return %arg0, %arg2 : i32, i32
  }
  func.func @transform_1(%arg0: i32, %arg1: i32, %arg2: i32) -> (i32, i32) {
    %c0_i32 = arith.constant 0 : i32
    return %arg1, %arg2 : i32, i32
  }
  func.func @transform_2(%arg0: i32, %arg1: i32, %arg2: i32) -> (i32, i32) {
    %c0_i32 = arith.constant 0 : i32
    return %arg0, %arg1 : i32, i32
  }
}

</mosaic_0001>

<bundles_post_ra>
// kernel: tpu_custom_call.1
= control target key start
LH: loop header
LB: loop body
LE: loop exit
PB: predicated region body
PF: predicated region fallthrough
CT: control target
= control target key end

     0   :  { %vm31_vm0 = vcmask 261120   ;;  %vm16_vm1 = vcmask 523264   ;;  %v256_v6 = vmov 0.0   ;;  %s347_s0 = inlined_call_operand.vmem [shape: f32[16,32], index: 0, kind: input, shape index: {}]   ;;  %s348_s1 = inlined_call_operand.vmem [shape: f32[64,32], index: 1, kind: input, shape index: {}]   ;;  %s349_s2 = inlined_call_operand.hbm [shape: f32[16,64], index: 2, kind: output, shape index: {}]  }
   0x1   :  { %v23_v0 = vld [vmem:[%s348_s1] sm:$0xff]  ;;  %v24_v1 = vld [vmem:[%s348_s1 + $0x8] sm:$0xff]  ;;  %v25_v2 = vld [vmem:[%s348_s1 + $0x10] sm:$0xff]  ;;  %18 = vst.msk [vmem:[#allocation2 + $0x8] sm:$0xff] %vm16_vm1, %v256_v6 }
   0x2   :  { %v204_v3 = vpack.c.bf16 %v24_v1, %v23_v0  ;;  %vm286_vm2 = vmpackc.low %vm31_vm0, %vm31_vm0  ;;  %v26_v5 = vld [vmem:[%s348_s1 + $0x18] sm:$0xff]  ;;  %17 = vst.msk [vmem:[#allocation2] sm:$0xff] %vm16_vm1, %v256_v6  ;;  %v21_v8 = vld [vmem:[%s347_s0] sm:$0xff] }
   0x3   :  { %v210_v7 = vpack.c.bf16 %v26_v5, %v25_v2 }
   0x4   :  { %206 = vmatprep.subr.msk.bf16.mxu0 %vm286_vm2, %v204_v3 }
   0x5   :  { %7 = vsyncpa [#allocation4], 0  ;;  %209 = vmatpush3.bf16.xpose.msk.msra.mxu0 %vm286_vm2, %v204_v3  ;;  %201 = vmatprep.mubr.msk.f32.mxu0 %vm31_vm0, %v21_v8  ;;  %v27_v9 = vld [vmem:[%s348_s1 + $0x20] sm:$0xff]  ;;  %v28_v10 = vld [vmem:[%s348_s1 + $0x28] sm:$0xff] }
   0x6   :  { %212 = vmatprep.subr.msk.bf16.mxu0 %vm286_vm2, %v210_v7  ;;  %v216_v11 = vpack.c.bf16 %v28_v10, %v27_v9  ;;  %v29_v12 = vld [vmem:[%s348_s1 + $0x30] sm:$0xff]  ;;  %v30_v13 = vld [vmem:[%s348_s1 + $0x38] sm:$0xff]  ;;  %v22_v15 = vld [vmem:[%s347_s0 + $0x8] sm:$0xff]  ;;  %s257_s1 = smov [#allocation3]  }
   0x7   :  { %v222_v14 = vpack.c.bf16 %v30_v13, %v29_v12  ;;  %s154_s29 = sshll.u32 %s257_s1, 4  ;;  %s155_s29 = int_to_ptr.vmem [resolvable:$true] %s154_s29 }
   0x8   :  { %v20_v16 = vld [vmem:[#allocation2 + $0x8] sm:$0xff]  ;;  %s232_s0 = scalar_lea.vmem %s155_s29, 256  ;;  %p237_p1 = scmp.lt.s32.totalorder %s155_s29, %s155_s29 }
   0x9   :  { %v19_v17 = vld [vmem:[#allocation2] sm:$0xff]  ;;  %p233_p0 = scmp.ne.s32.totalorder %s155_s29, %s232_s0  ;;  %p238_p2 = scmp.lt.s32.totalorder %s232_s0, %s232_s0 }
   0xb   :  { %p239_p3 = por %p238_p2, %p237_p1 }
   0xd   :  { %215 = vmatpush3.bf16.xpose.msk.msra.mxu0 %vm286_vm2, %v210_v7  ;;  %p240_p4 = pnand %p239_p3, %p233_p0 }
   0xe   :  { %218 = vmatprep.subr.msk.bf16.mxu0 %vm286_vm2, %v216_v11 }
  0x15   :  { %221 = vmatpush3.bf16.xpose.msk.msra.mxu0 %vm286_vm2, %v216_v11 }
  0x16   :  { %224 = vmatprep.subr.msk.bf16.mxu0 %vm286_vm2, %v222_v14 }
  0x1d   :  { %227 = vmatpush3.bf16.xpose.msk.msra.mxu0 %vm286_vm2, %v222_v14 }
  0x24   :  { %202 = vmatmul.mubr.msk.f32.vlgmr.msra.gmra.mrb[0].mxu0 %vm31_vm0, %v22_v15 }
  0xf7   :  { %v203_v18 = vpop.f32.mrb[0].mxu0 }
  0xf8   :  { %v138_v19 = vadd.f32 %v203_v18, %v20_v16  ;;  %v128_v20 = vpop.f32.mrb[1].mxu0 }
  0xf9   :  { %v137_v21 = vadd.f32 %v128_v20, %v19_v17 }
  0xfa   :  { %141 = vst.msk [vmem:[#allocation2 + $0x8] sm:$0xff] %vm16_vm1, %v138_v19 }
  0xfb   :  { %140 = vst.msk [vmem:[#allocation2] sm:$0xff] %vm16_vm1, %v137_v21 }
 0x101   :  { %v146_v22 = vld [vmem:[#allocation2 + $0x8] sm:$0xff] }
 0x102   :  { %v145_v23 = vld [vmem:[#allocation2] sm:$0xff]  ;;  %148 = vst.msk [vmem:[#allocation3 + $0x8] sm:$0xff] %vm16_vm1, %v146_v22 }
 0x103   :  { %147 = vst.msk [vmem:[#allocation3] sm:$0xff] %vm16_vm1, %v145_v23 }
 0x104   :  { %243 = shalt.err (!%p240_p4)
}
 0x105   :  { %s244_s4 = scalar_lea.hbm %s349_s2, 256 }
 0x106   :  { %p245_p5 = scmp.ne.s32.totalorder %s349_s2, %s244_s4  ;;  %p248_p6 = scmp.lt.u32.totalorder %s244_s4, %s349_s2 }
 0x108   :  { %p250_p7 = pnand %p248_p6, %p245_p5 }
 0x10a   :  { %253 = shalt.err (!%p250_p7)
}
 0x10b   :  { %s258_s9 = smov 128   ;;  %s259_s10 = smov 8  }
 0x10c   :  { %160 = dma.vmem_to_hbm [thread:$0]  %s155_s29, 256, %s349_s2, [#allocation4], %s258_s9, %s258_s9, %s259_s10  }
 0x10d   :  { %254 = dma.done.wait [#allocation4], 256  }
 0x10e   :  { %255 = vsyncadd [#allocation4], 4294967040 }
 0x10f   :  { %164 = vsyncpa [#allocation4], 1 }

</bundles_post_ra>
